<compile_context>
chip_gen: v6e
topology: v6e:2x2x1
jax: 0.10.0
libtpu: 0.0.40
codegen_flags: <defaults>
</compile_context>

<pallas_src>
import random

import jax
import jax.numpy as jnp
import numpy as np
from jax.experimental import pallas as pl
from jax.experimental.pallas import tpu as pltpu

# CTPN_Loss.__init__ constants (no learnable parameters).
NS = 128          # self.Ns
RATIO = 0.5       # self.ratio
LAMBDA1 = 1.0     # self.lambda1
LAMBDA2 = 1.0     # self.lambda2

LANE = 128        # lane-width quantum used for static padding buckets


# ----------------------------------------------------------------------------
# Pallas kernel: CE + SmoothL1 + masked reductions + weighted total loss
# ----------------------------------------------------------------------------
def _ctpn_loss_kernel(counts_ref, cls_ref, reg_ref, tgt_ref, out_ref):
    """counts_ref: SMEM int32[3] = [positive_num, Nv, No]
       cls_ref   : VMEM f32[2, L]  sampled cls logits (class 0 / class 1),
                   positives packed first along the lane axis
       reg_ref   : VMEM f32[3, L]  rows 0/1 = vertical preds (coord 0/1),
                                   row 2    = side-refinement pred
       tgt_ref   : VMEM f32[3, L]  matching regression targets
       out_ref   : VMEM f32[1, L]; lanes 0..3 = [total, cls, v, o]
    """
    L = cls_ref.shape[1]
    lane1 = jax.lax.broadcasted_iota(jnp.int32, (1, L), 1)       # (1, L)

    pos_num = counts_ref[0]
    nv = counts_ref[1]
    no = counts_ref[2]

    # ---- classification: 2-class cross-entropy as softplus of the margin ----
    l0 = cls_ref[0:1, :]
    l1 = cls_ref[1:2, :]
    is_pos = lane1 < pos_num                                     # label 1 then 0
    picked = jnp.where(is_pos, l1, l0)
    other = jnp.where(is_pos, l0, l1)
    z = other - picked
    # stable softplus(z) = lse(l0, l1) - picked ; one exp + one log on the EUP
    ce = jnp.maximum(z, 0.0) + jnp.log(1.0 + jnp.exp(-jnp.abs(z)))
    ce = jnp.where(lane1 < NS, ce, 0.0)                          # always mask pad
    cls_loss = jnp.sum(ce, axis=-1, keepdims=True) / float(NS)   # (1, 1)

    # ---- SmoothL1 (beta = 1) on one (3, L) block, single masked lane-sum ----
    d = reg_ref[...] - tgt_ref[...]                              # (3, L)
    ad = jnp.abs(d)
    sl = jnp.where(ad < 1.0, 0.5 * d * d, ad - 0.5)              # (3, L)
    row = jax.lax.broadcasted_iota(jnp.int32, (3, L), 0)
    lane3 = jax.lax.broadcasted_iota(jnp.int32, (3, L), 1)
    cnt = jnp.where(row < 2, nv, no)                             # rows 0/1 -> Nv
    sl = jnp.where(lane3 < cnt, sl, 0.0)
    sums = jnp.sum(sl, axis=-1, keepdims=True)                   # (3, 1)

    # TODO(synk): PyTorch raises ZeroDivisionError on empty regression lists;
    # we return 0 for that branch via the max(n, 1) guard instead.
    nv_f = jnp.maximum(nv, 1).astype(jnp.float32)
    no_f = jnp.maximum(no, 1).astype(jnp.float32)
    v_loss = 0.5 * (sums[0:1] + sums[1:2]) / nv_f                # (1, 1)
    o_loss = sums[2:3] / no_f                                    # (1, 1)

    total = cls_loss + LAMBDA1 * v_loss + LAMBDA2 * o_loss       # (1, 1)

    # single lane-dense output: [total, cls, v, o] in lanes 0..3
    out_ref[...] = (jnp.where(lane1 == 0, total, 0.0)
                    + jnp.where(lane1 == 1, cls_loss, 0.0)
                    + jnp.where(lane1 == 2, v_loss, 0.0)
                    + jnp.where(lane1 == 3, o_loss, 0.0))


# ----------------------------------------------------------------------------
# Device-side glue: three tiny per-source gathers + one gridless pallas_call
# ----------------------------------------------------------------------------
@jax.jit
def _device_loss(score, vertical_pred, side_refinement, idx_all, targets, counts):
    # idx_all: int32[5, L]  rows 0/1 -> score, rows 2/3 -> vertical_pred,
    #                       row 4 -> side_refinement
    # Gather from each source separately (no feature-map concatenation),
    # cast AFTER the gather so only ~8*L values are touched/upcast.
    cls_rows = jnp.take(score.reshape(-1), idx_all[0:2], axis=0).astype(jnp.float32)
    v_rows = jnp.take(vertical_pred.reshape(-1), idx_all[2:4], axis=0).astype(jnp.float32)
    o_rows = jnp.take(side_refinement.reshape(-1), idx_all[4:5], axis=0).astype(jnp.float32)
    reg_rows = jnp.concatenate([v_rows, o_rows], axis=0)          # (3, L), ~KBs
    L = cls_rows.shape[1]
    return pl.pallas_call(
        _ctpn_loss_kernel,
        out_shape=jax.ShapeDtypeStruct((1, L), jnp.float32),
        in_specs=[pl.BlockSpec(memory_space=pltpu.MemorySpace.SMEM),
                  pl.BlockSpec(memory_space=pltpu.MemorySpace.VMEM),
                  pl.BlockSpec(memory_space=pltpu.MemorySpace.VMEM),
                  pl.BlockSpec(memory_space=pltpu.MemorySpace.VMEM)],
        out_specs=pl.BlockSpec(memory_space=pltpu.MemorySpace.VMEM),
    )(counts, cls_rows, reg_rows, targets)


# ----------------------------------------------------------------------------
# Host wrapper: sampling + flat-index construction (numpy), then the kernel
# ----------------------------------------------------------------------------
def _xyk(entries):
    a = np.asarray([e[:3] for e in entries], dtype=np.int64)
    return a[:, 0], a[:, 1], a[:, 2]


def ctpn_loss(score, vertical_pred, side_refinement,
              positive, negative, vertical_reg, side_refinement_reg, seed=0):
    _, _, H, W = score.shape
    khw = H * W

    positive_num = min(int(NS * RATIO), len(positive))
    negative_num = NS - positive_num
    # TODO(synk): PyTorch uses unseeded random.sample; we use a seeded RNG for
    # deterministic, reproducible sampling with otherwise identical semantics.
    rng = random.Random(seed)
    positive_batch = rng.sample(positive, positive_num)
    negative_batch = rng.sample(negative, negative_num)

    nv = len(vertical_reg)
    no = len(side_refinement_reg)
    # static, bucketed lane width (multiple of 128) -> cached compile per bucket
    L = LANE * max(1, -(-max(NS, nv, no) // LANE))

    idx_all = np.zeros((5, L), dtype=np.int32)

    # rows 0/1: classification logits for the Ns sampled anchors (pos then neg)
    xs, ys, ks = _xyk(positive_batch + negative_batch)
    base = ys * W + xs
    idx_all[0, :NS] = (2 * ks) * khw + base
    idx_all[1, :NS] = (2 * ks + 1) * khw + base

    # rows 2/3: vertical predictions ; row 4: side-refinement predictions
    if nv:
        xv, yv, kv = _xyk(vertical_reg)
        bv = yv * W + xv
        idx_all[2, :nv] = (2 * kv) * khw + bv
        idx_all[3, :nv] = (2 * kv + 1) * khw + bv
    if no:
        xo, yo, ko = _xyk(side_refinement_reg)
        idx_all[4, :no] = ko * khw + yo * W + xo

    # regression targets, passed straight to VMEM (no identity gather)
    targets = np.zeros((3, L), dtype=np.float32)
    if nv:
        vr = np.asarray(vertical_reg, dtype=np.float32)
        targets[0, :nv] = vr[:, 3]
        targets[1, :nv] = vr[:, 4]
    if no:
        sr = np.asarray(side_refinement_reg, dtype=np.float32)
        targets[2, :no] = sr[:, 3]

    counts = np.array([positive_num, nv, no], dtype=np.int32)

    # one packed host->device push of the small per-call metadata
    idx_d, tgt_d, cnt_d = jax.device_put((idx_all, targets, counts))
    out = _device_loss(score, vertical_pred, side_refinement, idx_d, tgt_d, cnt_d)

    # single device->host readback for all four scalars
    res = np.asarray(jax.device_get(out))[0, :4]
    return float(res[0]), float(res[1]), float(res[2]), float(res[3])


# ----------------------------------------------------------------------------
# Pure-numpy reference (mirrors the PyTorch forward) for verification
# ----------------------------------------------------------------------------
def _reference(score, vertical_pred, side_refinement,
               positive, negative, vertical_reg, side_refinement_reg, seed=0):
    score = np.asarray(score); vp = np.asarray(vertical_pred)
    sr = np.asarray(side_refinement)
    positive_num = min(int(NS * RATIO), len(positive))
    negative_num = NS - positive_num
    rng = random.Random(seed)
    pos_b = rng.sample(positive, positive_num)
    neg_b = rng.sample(negative, negative_num)

    def ce(logits, label):
        m = logits.max()
        lse = m + np.log(np.exp(logits - m).sum())
        return lse - logits[label]

    def sl1(d):
        ad = np.abs(d)
        return np.where(ad < 1.0, 0.5 * d * d, ad - 0.5)

    cls_loss = 0.0
    for p in pos_b:
        cls_loss += ce(score[0, p[2] * 2:(p[2] + 1) * 2, p[1], p[0]], 1)
    for n in neg_b:
        cls_loss += ce(score[0, n[2] * 2:(n[2] + 1) * 2, n[1], n[0]], 0)
    cls_loss /= NS

    v_loss = 0.0
    for v in vertical_reg:
        pred = vp[0, v[2] * 2:(v[2] + 1) * 2, v[1], v[0]]
        v_loss += sl1(pred - np.array([v[3], v[4]], np.float32)).mean()
    v_loss /= float(len(vertical_reg))

    o_loss = 0.0
    for s in side_refinement_reg:
        pred = sr[0, s[2]:s[2] + 1, s[1], s[0]]
        o_loss += sl1(pred - np.array([s[3]], np.float32)).mean()
    o_loss /= float(len(side_refinement_reg))

    return cls_loss + LAMBDA1 * v_loss + LAMBDA2 * o_loss, cls_loss, v_loss, o_loss


if __name__ == "__main__":
    K, H, W = 4, 16, 16
    key = jax.random.PRNGKey(0)
    k1, k2, k3 = jax.random.split(key, 3)
    score = jax.random.normal(k1, (1, 2 * K, H, W), dtype=jnp.float32)
    vertical_pred = jax.random.normal(k2, (1, 2 * K, H, W), dtype=jnp.float32)
    side_refinement = jax.random.normal(k3, (1, K, H, W), dtype=jnp.float32)

    # deterministic synthetic ground-truth lists (x, y, k, ...)
    idx_rng = random.Random(42)
    positive = [(idx_rng.randrange(W), idx_rng.randrange(H), idx_rng.randrange(K))
                for _ in range(10)]
    negative = [(idx_rng.randrange(W), idx_rng.randrange(H), idx_rng.randrange(K))
                for _ in range(150)]
    vertical_reg = [(idx_rng.randrange(W), idx_rng.randrange(H), idx_rng.randrange(K),
                     idx_rng.uniform(-2.0, 2.0), idx_rng.uniform(-2.0, 2.0))
                    for _ in range(12)]
    side_refinement_reg = [(idx_rng.randrange(W), idx_rng.randrange(H),
                            idx_rng.randrange(K), idx_rng.uniform(-2.0, 2.0))
                           for _ in range(6)]

    outs = ctpn_loss(score, vertical_pred, side_refinement,
                     positive, negative, vertical_reg, side_refinement_reg, seed=0)
    outs = jax.block_until_ready(outs)

    ref = _reference(score, vertical_pred, side_refinement,
                     positive, negative, vertical_reg, side_refinement_reg, seed=0)
    np.testing.assert_allclose(np.array([float(o) for o in outs]),
                               np.array([float(r) for r in ref]),
                               rtol=1e-4, atol=1e-5)
    print("KERNEL_OK")
</pallas_src>

<mosaic_0001>
module attributes {stable_mosaic.version = 11 : i64} {
  func.func @_ctpn_loss_kernel(%arg0: memref<3xi32, #tpu.memory_space<smem>>, %arg1: memref<2x128xf32, #tpu.memory_space<vmem>>, %arg2: memref<3x128xf32, #tpu.memory_space<vmem>>, %arg3: memref<3x128xf32, #tpu.memory_space<vmem>>, %arg4: memref<1x128xf32, #tpu.memory_space<vmem>>) attributes {dimension_semantics = [], scalar_prefetch = 0 : i64, scratch_operands = 0 : i64, tpu.core_type = #tpu.core_type<tc>} {
    %0 = tpu.iota {dimensions = array<i32: 1>} : vector<1x128xi32>
    %c0 = arith.constant 0 : index
    %1 = memref.load %arg0[%c0] : memref<3xi32, #tpu.memory_space<smem>>
    %c1 = arith.constant 1 : index
    %2 = memref.load %arg0[%c1] : memref<3xi32, #tpu.memory_space<smem>>
    %c2 = arith.constant 2 : index
    %3 = memref.load %arg0[%c2] : memref<3xi32, #tpu.memory_space<smem>>
    %c0_0 = arith.constant 0 : index
    %c0_1 = arith.constant 0 : index
    %4 = vector.load %arg1[%c0_0, %c0_1] : memref<2x128xf32, #tpu.memory_space<vmem>>, vector<1x128xf32>
    %c1_2 = arith.constant 1 : index
    %c0_3 = arith.constant 0 : index
    %5 = vector.load %arg1[%c1_2, %c0_3] : memref<2x128xf32, #tpu.memory_space<vmem>>, vector<1x128xf32>
    %6 = vector.broadcast %1 : i32 to vector<1x128xi32>
    %7 = arith.cmpi slt, %0, %6 : vector<1x128xi32>
    %8 = arith.select %7, %5, %4 : vector<1x128xi1>, vector<1x128xf32>
    %9 = arith.select %7, %4, %5 : vector<1x128xi1>, vector<1x128xf32>
    %10 = arith.subf %9, %8 : vector<1x128xf32>
    %cst = arith.constant 0.000000e+00 : f32
    %11 = vector.broadcast %cst : f32 to vector<1x128xf32>
    %12 = arith.maximumf %10, %11 : vector<1x128xf32>
    %13 = math.absf %10 : vector<1x128xf32>
    %cst_4 = arith.constant 0.000000e+00 : f32
    %14 = vector.broadcast %cst_4 : f32 to vector<1x128xf32>
    %15 = arith.subf %14, %13 : vector<1x128xf32>
    %16 = math.exp %15 : vector<1x128xf32>
    %cst_5 = arith.constant 1.000000e+00 : f32
    %17 = vector.broadcast %cst_5 : f32 to vector<1x128xf32>
    %18 = arith.addf %17, %16 : vector<1x128xf32>
    %19 = math.log %18 : vector<1x128xf32>
    %20 = arith.addf %12, %19 : vector<1x128xf32>
    %c128_i32 = arith.constant 128 : i32
    %21 = vector.broadcast %c128_i32 : i32 to vector<1x128xi32>
    %22 = arith.cmpi slt, %0, %21 : vector<1x128xi32>
    %cst_6 = arith.constant 0.000000e+00 : f32
    %23 = vector.broadcast %cst_6 : f32 to vector<1x128xf32>
    %24 = arith.select %22, %20, %23 : vector<1x128xi1>, vector<1x128xf32>
    %cst_7 = arith.constant dense<0.000000e+00> : vector<1xf32>
    %25 = vector.multi_reduction <add>, %24, %cst_7 [1] : vector<1x128xf32> to vector<1xf32>
    %26 = vector.shape_cast %25 : vector<1xf32> to vector<1x1xf32>
    %cst_8 = arith.constant 1.280000e+02 : f32
    %27 = vector.broadcast %cst_8 : f32 to vector<1x1xf32>
    %28 = arith.divf %26, %27 : vector<1x1xf32>
    %c0_9 = arith.constant 0 : index
    %c0_10 = arith.constant 0 : index
    %29 = vector.load %arg2[%c0_9, %c0_10] : memref<3x128xf32, #tpu.memory_space<vmem>>, vector<3x128xf32>
    %c0_11 = arith.constant 0 : index
    %c0_12 = arith.constant 0 : index
    %30 = vector.load %arg3[%c0_11, %c0_12] : memref<3x128xf32, #tpu.memory_space<vmem>>, vector<3x128xf32>
    %31 = arith.subf %29, %30 : vector<3x128xf32>
    %32 = math.absf %31 : vector<3x128xf32>
    %cst_13 = arith.constant 1.000000e+00 : f32
    %33 = vector.broadcast %cst_13 : f32 to vector<3x128xf32>
    %34 = arith.cmpf olt, %32, %33 : vector<3x128xf32>
    %cst_14 = arith.constant 5.000000e-01 : f32
    %35 = vector.broadcast %cst_14 : f32 to vector<3x128xf32>
    %36 = arith.mulf %35, %31 : vector<3x128xf32>
    %37 = arith.mulf %36, %31 : vector<3x128xf32>
    %cst_15 = arith.constant 5.000000e-01 : f32
    %38 = vector.broadcast %cst_15 : f32 to vector<3x128xf32>
    %39 = arith.subf %32, %38 : vector<3x128xf32>
    %40 = arith.select %34, %37, %39 : vector<3x128xi1>, vector<3x128xf32>
    %41 = tpu.iota {dimensions = array<i32: 0>} : vector<3x128xi32>
    %42 = tpu.iota {dimensions = array<i32: 1>} : vector<3x128xi32>
    %c2_i32 = arith.constant 2 : i32
    %43 = vector.broadcast %c2_i32 : i32 to vector<3x128xi32>
    %44 = arith.cmpi slt, %41, %43 : vector<3x128xi32>
    %45 = vector.broadcast %2 : i32 to vector<3x128xi32>
    %46 = vector.broadcast %3 : i32 to vector<3x128xi32>
    %47 = arith.select %44, %45, %46 : vector<3x128xi1>, vector<3x128xi32>
    %48 = arith.cmpi slt, %42, %47 : vector<3x128xi32>
    %cst_16 = arith.constant 0.000000e+00 : f32
    %49 = vector.broadcast %cst_16 : f32 to vector<3x128xf32>
    %50 = arith.select %48, %40, %49 : vector<3x128xi1>, vector<3x128xf32>
    %cst_17 = arith.constant dense<0.000000e+00> : vector<3xf32>
    %51 = vector.multi_reduction <add>, %50, %cst_17 [1] : vector<3x128xf32> to vector<3xf32>
    %52 = vector.shape_cast %51 : vector<3xf32> to vector<3x1xf32>
    %c1_i32 = arith.constant 1 : i32
    %53 = arith.maxsi %2, %c1_i32 : i32
    %54 = arith.sitofp %53 : i32 to f32
    %c1_i32_18 = arith.constant 1 : i32
    %55 = arith.maxsi %3, %c1_i32_18 : i32
    %56 = arith.sitofp %55 : i32 to f32
    %57 = vector.extract_strided_slice %52 {offsets = [0, 0], sizes = [1, 1], strides = [1, 1]} : vector<3x1xf32> to vector<1x1xf32>
    %58 = vector.extract_strided_slice %52 {offsets = [1, 0], sizes = [1, 1], strides = [1, 1]} : vector<3x1xf32> to vector<1x1xf32>
    %59 = arith.addf %57, %58 : vector<1x1xf32>
    %cst_19 = arith.constant 5.000000e-01 : f32
    %60 = vector.broadcast %cst_19 : f32 to vector<1x1xf32>
    %61 = arith.mulf %60, %59 : vector<1x1xf32>
    %62 = vector.broadcast %54 : f32 to vector<1x1xf32>
    %63 = arith.divf %61, %62 : vector<1x1xf32>
    %64 = vector.extract_strided_slice %52 {offsets = [2, 0], sizes = [1, 1], strides = [1, 1]} : vector<3x1xf32> to vector<1x1xf32>
    %65 = vector.broadcast %56 : f32 to vector<1x1xf32>
    %66 = arith.divf %64, %65 : vector<1x1xf32>
    %cst_20 = arith.constant 1.000000e+00 : f32
    %67 = vector.broadcast %cst_20 : f32 to vector<1x1xf32>
    %68 = arith.mulf %67, %63 : vector<1x1xf32>
    %69 = arith.addf %28, %68 : vector<1x1xf32>
    %cst_21 = arith.constant 1.000000e+00 : f32
    %70 = vector.broadcast %cst_21 : f32 to vector<1x1xf32>
    %71 = arith.mulf %70, %66 : vector<1x1xf32>
    %72 = arith.addf %69, %71 : vector<1x1xf32>
    %c0_i32 = arith.constant 0 : i32
    %73 = vector.broadcast %c0_i32 : i32 to vector<1x128xi32>
    %74 = arith.cmpi eq, %0, %73 : vector<1x128xi32>
    %cst_22 = arith.constant 0.000000e+00 : f32
    %75 = vector.shape_cast %72 : vector<1x1xf32> to vector<1x1xf32>
    %76 = vector.broadcast %75 : vector<1x1xf32> to vector<1x128xf32>
    %77 = vector.broadcast %cst_22 : f32 to vector<1x128xf32>
    %78 = arith.select %74, %76, %77 : vector<1x128xi1>, vector<1x128xf32>
    %c1_i32_23 = arith.constant 1 : i32
    %79 = vector.broadcast %c1_i32_23 : i32 to vector<1x128xi32>
    %80 = arith.cmpi eq, %0, %79 : vector<1x128xi32>
    %cst_24 = arith.constant 0.000000e+00 : f32
    %81 = vector.shape_cast %28 : vector<1x1xf32> to vector<1x1xf32>
    %82 = vector.broadcast %81 : vector<1x1xf32> to vector<1x128xf32>
    %83 = vector.broadcast %cst_24 : f32 to vector<1x128xf32>
    %84 = arith.select %80, %82, %83 : vector<1x128xi1>, vector<1x128xf32>
    %85 = arith.addf %78, %84 : vector<1x128xf32>
    %c2_i32_25 = arith.constant 2 : i32
    %86 = vector.broadcast %c2_i32_25 : i32 to vector<1x128xi32>
    %87 = arith.cmpi eq, %0, %86 : vector<1x128xi32>
    %cst_26 = arith.constant 0.000000e+00 : f32
    %88 = vector.shape_cast %63 : vector<1x1xf32> to vector<1x1xf32>
    %89 = vector.broadcast %88 : vector<1x1xf32> to vector<1x128xf32>
    %90 = vector.broadcast %cst_26 : f32 to vector<1x128xf32>
    %91 = arith.select %87, %89, %90 : vector<1x128xi1>, vector<1x128xf32>
    %92 = arith.addf %85, %91 : vector<1x128xf32>
    %c3_i32 = arith.constant 3 : i32
    %93 = vector.broadcast %c3_i32 : i32 to vector<1x128xi32>
    %94 = arith.cmpi eq, %0, %93 : vector<1x128xi32>
    %cst_27 = arith.constant 0.000000e+00 : f32
    %95 = vector.shape_cast %66 : vector<1x1xf32> to vector<1x1xf32>
    %96 = vector.broadcast %95 : vector<1x1xf32> to vector<1x128xf32>
    %97 = vector.broadcast %cst_27 : f32 to vector<1x128xf32>
    %98 = arith.select %94, %96, %97 : vector<1x128xi1>, vector<1x128xf32>
    %99 = arith.addf %92, %98 : vector<1x128xf32>
    %c0_28 = arith.constant 0 : index
    %c0_29 = arith.constant 0 : index
    %100 = vector.load %arg4[%c0_28, %c0_29] : memref<1x128xf32, #tpu.memory_space<vmem>>, vector<1x128xf32>
    tpu.vector_store %arg4[%c0_28, %c0_29], %99 {strides = array<i32>} : memref<1x128xf32, #tpu.memory_space<vmem>>, vector<1x128xf32>,
    return
  }
}

</mosaic_0001>

<bundles_post_ra>
// kernel: _device_loss.1
= control target key start
LH: loop header
LB: loop body
LE: loop exit
PB: predicated region body
PF: predicated region fallthrough
CT: control target
= control target key end

     0   :  { %9 = vsyncpa [#allocation4], 0  ;;  %s259_s0 = inlined_call_operand.vmem [shape: s32[3], index: 0, kind: input, shape index: {}]   ;;  %s260_s1 = inlined_call_operand.vmem [shape: f32[2,128], index: 1, kind: input, shape index: {}]   ;;  %s261_s2 = inlined_call_operand.vmem [shape: f32[3,128], index: 2, kind: input, shape index: {}]   ;;  %s262_s3 = inlined_call_operand.vmem [shape: f32[3,128], index: 3, kind: input, shape index: {}]   ;;  %s263_s4 = inlined_call_operand.hbm [shape: f32[1,128], index: 4, kind: output, shape index: {}]  }
   0x1   :  { %10 = vsyncpa [#allocation3], 0  ;;  %s17_s17 = sshll.u32 %s259_s0, 4  ;;  %s18_s17 = int_to_ptr.vmem [resolvable:$true] %s17_s17 }
   0x2   :  { %s159_s18 = scalar_lea.vmem %s18_s17, 16  ;;  %p164_p1 = scmp.lt.s32.totalorder %s18_s17, %s18_s17 }
   0x3   :  { %p160_p0 = scmp.ne.s32.totalorder %s18_s17, %s159_s18  ;;  %p165_p2 = scmp.lt.s32.totalorder %s159_s18, %s159_s18 }
   0x5   :  { %p166_p3 = por %p165_p2, %p164_p1 }
   0x7   :  { %p167_p4 = pnand %p166_p3, %p160_p0 }
   0x9   :  { %170 = shalt.err (!%p167_p4)
}
   0xa   :  { %s195_s19 = smov [#allocation2]  }
   0xb   :  { %20 = dma.vmem_to_smem %s18_s17, 16, %s195_s19, [#allocation4]  }
   0xc   :  { %191 = dma.done.wait [#allocation4], 16  }
   0xd   :  { %192 = vsyncadd [#allocation4], 4294967280 }
   0xe   :  { %30 = sfence }
   0xf   :  { %v31_v0 = vlaneseq  ;;  %s226_s20 = sld [smem:[#allocation2 + $0x1]]  ;;  %v60_v1 = vld [vmem:[%s261_s2] sm:$0x7]  ;;  %vm77_vm2 = vcmask 1042432   ;;  %vm54_vm5 = vcmask 1040384   ;;  %v196_v32 = vmov 0  }
  0x10   :  { %v61_v2 = vld [vmem:[%s262_s3] sm:$0x7]  ;;  %s234_s24 = sld [smem:[#allocation2 + $0x2]]  ;;  %149 = vset.pattern.permute.xlu1 %v196_v32  ;;  %150 = vset.pattern.permute.xlu0 %v196_v32  ;;  %s197_s29 = smov [#allocation5]  }
  0x11   :  { %v62_v3 = vsub.f32 %v60_v1, %v61_v2  ;;  %v70_v4 = vshrl.u32 %v31_v0, 7  ;;  %s33_s25 = sld [smem:[#allocation2]]  ;;  %v236_v7 = vand.u32 127, %v31_v0  ;;  %v36_v13 = vld [vmem:[%s260_s1] sm:$0x1]  ;;  %s134_s30 = sshll.u32 %s197_s29, 4  ;;  %s135_s30 = int_to_ptr.vmem [resolvable:$true] %s134_s30 }
  0x12   :  { %v37_v14 = vld [vmem:[%s260_s1 + $0x1] sm:$0x1]  ;;  %s171_s5 = scalar_lea.vmem %s135_s30, 16  ;;  %s175_s6 = scalar_lea.vmem %s135_s30, 32 }
  0x13   :  { %v63_v5 = vand.u32 2147483647, %v62_v3  ;;  %v65_v6 = vmul.f32 0.5, %v62_v3  ;;  %vm71_vm1 = vcmp.lt.s32.totalorder %v70_v4, 2  ;;  %vm103_vm6 = vcmp.eq.s32.totalorder %v236_v7, 0  ;;  %p172_p7 = scmp.ne.s32.totalorder %s135_s30, %s171_s5  ;;  %p176_p8 = scmp.lt.s32.totalorder %s135_s30, %s135_s30 }
  0x14   :  { %vm110_vm7 = vcmp.eq.s32.totalorder %v236_v7, 1  ;;  %vm121_vm8 = vcmp.eq.s32.totalorder %v236_v7, 3  ;;  %vm113_vm9 = vcmp.eq.s32.totalorder %v236_v7, 2  ;;  %p177_p9 = scmp.lt.s32.totalorder %s175_s6, %s171_s5 }
  0x15   :  { %vm64_vm0 = vcmp.lt.f32.partialorder %v63_v5, 1.0  ;;  %v66_v8 = vmul.f32 %v65_v6, %v62_v3  ;;  %v145_v9 = vadd.f32 -0.5, %v63_v5  ;;  %v72_v10 = vstv %s226_s20  ;;  %p81_p6 = scmp.gt.s32.totalorder %s226_s20, 1 }
  0x16   :  { %v73_v12 = vstv %s234_s24  ;;  %p84_p5 = scmp.gt.s32.totalorder %s234_s24, 1  ;;  %p178_p10 = por %p177_p9, %p176_p8 }
  0x17   :  { %v68_v11 = vsel %vm64_vm0, %v66_v8, %v145_v9  ;;  %v74_v15 = vsel %vm71_vm1, %v72_v10, %v73_v12  ;;  %v38_v16 = vstv %s33_s25  ;;  %s267_s20 = smov (!%p81_p6, %s226_s20), 1 }
  0x18   :  { %vm75_vm3 = vcmp.lt.s32.totalorder %v236_v7, %v74_v15  ;;  %vm39_vm4 = vcmp.lt.s32.totalorder %v236_v7, %v38_v16  ;;  %s265_s24 = smov (!%p84_p5, %s234_s24), 1  ;;  %s83_s28 = scvt.s32.f32 %s267_s20 }
  0x19   :  { %v76_v17 = vsel %vm75_vm3, %v68_v11, 0.0  ;;  %v40_v18 = vsel %vm39_vm4, %v37_v14, %v36_v13  ;;  %v41_v19 = vsel %vm39_vm4, %v36_v13, %v37_v14  ;;  %s86_s1 = scvt.s32.f32 %s265_s24  ;;  %p179_p11 = pnand %p178_p10, %p172_p7 }
  0x1a   :  { %v78_v20 = vsel %vm77_vm2, %v76_v17, 0.0  ;;  %v42_v21 = vsub.f32 %v41_v19, %v40_v18  ;;  %v92_v34 = vstv %s83_s28 }
  0x1b   :  { %79 = vadd.xlane.f32.xlu0 %v78_v20  ;;  %v95_v33 = vstv %s86_s1 }
  0x1c   :  { %v44_v22 = vand.u32 2147483647, %v42_v21  ;;  %v43_v27 = vmax.f32 %v42_v21, 0.0 }
  0x1e   :  { %v45_v23 = vsub.f32 0.0, %v44_v22 }
  0x20   :  { %v46_v24 = vmul.f32 1.442695, %v45_v23 }
  0x22   :  { %151 = vpow2.f32 %v46_v24 }
  0x2f   :  { %v152_v25 = vpop.eup %151 }
  0x30   :  { %v48_v26 = vadd.f32 1.0, %v152_v25 }
  0x32   :  { %153 = vlog2.f32 %v48_v26 }
  0x33   :  { %155 = vrcp.f32 %v95_v33 }
  0x34   :  { %157 = vrcp.f32 %v92_v34 }
  0x3f   :  { %v154_v28 = vpop.eup %153 }
  0x40   :  { %v50_v29 = vmul.f32 0.6931472, %v154_v28  ;;  %v156_v38 = vpop.eup %155 }
  0x41   :  { %v158_v40 = vpop.eup %157 }
  0x42   :  { %v51_v30 = vadd.f32 %v50_v29, %v43_v27 }
  0x44   :  { %v55_v31 = vsel %vm54_vm5, %v51_v30, 0.0 }
  0x45   :  { %56 = vadd.xlane.f32.xlu0 %v55_v31 }
  0xa4   :  { %v80_v35 = vpop.xlane.xlu0 %79 }
  0xa5   :  { %v88_v36 = vrot.slane %v80_v35, 1  ;;  %v97_v41 = vmul.f32 %v156_v38, %v80_v35 }
  0xa7   :  { %v90_v37 = vadd.f32 %v88_v36, %v80_v35  ;;  %v100_v46 = vrot.slane %v97_v41, 2  ;;  %v122_v51 = vsel %vm121_vm8, %v97_v41, 0.0 }
  0xa8   :  { %v124_v56 = vrot.slane %v122_v51, 2 }
  0xa9   :  { %v91_v39 = vmul.f32 0.5, %v90_v37 }
  0xab   :  { %v94_v43 = vmul.f32 %v158_v40, %v91_v39 }
  0xce   :  { %v57_v42 = vpop.xlane.xlu0 %56 }
  0xcf   :  { %v59_v44 = vmul.f32 0.0078125, %v57_v42 }
  0xd1   :  { %v98_v45 = vadd.f32 %v94_v43, %v59_v44  ;;  %v111_v50 = vsel %vm110_vm7, %v59_v44, 0.0 }
  0xd3   :  { %v102_v47 = vadd.f32 %v100_v46, %v98_v45 }
  0xd5   :  { %106 = vperm.xlu1 %149, %v102_v47  }
  0xd9   :  { %116 = vperm.xlu1 %149, %v94_v43  }
 0x150   :  { %v107_v48 = vpop.permute.xlu1 %106 }
 0x151   :  { %v109_v49 = vsel %vm103_vm6, %v107_v48, 0.0 }
 0x152   :  { %v112_v52 = vadd.f32 %v111_v50, %v109_v49 }
 0x154   :  { %v117_v53 = vpop.permute.xlu1 %116 }
 0x155   :  { %v119_v54 = vsel %vm113_vm9, %v117_v53, 0.0 }
 0x156   :  { %v120_v55 = vadd.f32 %v119_v54, %v112_v52 }
 0x158   :  { %v126_v57 = vadd.f32 %v124_v56, %v120_v55 }
 0x15a   :  { %127 = vst [vmem:[#allocation5] sm:$0x1] %v126_v57 }
 0x15b   :  { %182 = shalt.err (!%p179_p11)
}
 0x15c   :  { %137 = dma.vmem_to_hbm [thread:$0]  %s135_s30, 16, %s263_s4, [#allocation3]  }
 0x15d   :  { %193 = dma.done.wait [#allocation3], 16  }
 0x15e   :  { %194 = vsyncadd [#allocation3], 4294967280 }
 0x15f   :  { %141 = vsyncpa [#allocation3], 1 }
 0x160   :  { %142 = vsyncpa [#allocation4], 1 }

</bundles_post_ra>
